<compile_context>
chip_gen: v5e
topology: v5e:2x2
jax: 0.10.0
libtpu: 0.0.40
codegen_flags: <defaults>
</compile_context>

<pallas_src>
import jax
import jax.numpy as jnp
from jax.experimental import pallas as pl
from jax.experimental.pallas import tpu as pltpu


def _identity_kernel(x_ref, o_ref):
    # Pass the current VMEM tile straight through.
    o_ref[...] = x_ref[...]


# 2 MiB per block: (2 input + 2 output) double buffers = 8 MiB VMEM,
# comfortably under default scoped VMEM on v5e (16 MiB), v6e and v7x (32 MiB).
_TARGET_BLOCK_BYTES = 2 * 1024 * 1024
_LANE = 128


def _copy_tiled_2d(x2d: jax.Array, alias: bool) -> jax.Array:
    """Copy a (rows, lane_w) array (lane_w a multiple of 128) tile by tile."""
    rows, lane_w = x2d.shape
    itemsize = jnp.dtype(x2d.dtype).itemsize
    # Minimum sublane tiling: 8 for 4-byte, 16 for 2-byte, 32 for 1-byte dtypes.
    sublane_min = max(8, 32 // itemsize)
    block_rows = (_TARGET_BLOCK_BYTES // (lane_w * itemsize)) // sublane_min * sublane_min
    block_rows = max(sublane_min, block_rows)
    if block_rows >= rows:
        block_rows = rows  # full extent is always a legal block dim
    grid = (pl.cdiv(rows, block_rows),)  # partial last block is masked by Pallas

    nbytes = x2d.size * itemsize
    return pl.pallas_call(
        _identity_kernel,
        out_shape=jax.ShapeDtypeStruct((rows, lane_w), x2d.dtype),
        grid_spec=pltpu.PrefetchScalarGridSpec(
            num_scalar_prefetch=0,
            grid=grid,
            in_specs=[pl.BlockSpec((block_rows, lane_w), lambda i: (i, 0))],
            out_specs=pl.BlockSpec((block_rows, lane_w), lambda i: (i, 0)),
        ),
        compiler_params=pltpu.CompilerParams(
            # Megacore: on v7x the 2 TensorCores each take half the copy grid.
            dimension_semantics=("parallel",),
        ),
        # Reuse the input HBM buffer for the output (identity is in-place safe).
        input_output_aliases=({0: 0} if alias else {}),
        cost_estimate=pl.CostEstimate(
            flops=0, transcendentals=0, bytes_accessed=2 * nbytes
        ),
    )(x2d)


def identity(x: jax.Array) -> jax.Array:
    """Pallas identity: y = x, same shape and dtype."""
    orig_shape = x.shape
    total = x.size
    if total == 0:
        return x
    itemsize = jnp.dtype(x.dtype).itemsize

    # Pick the widest lane-dense width (multiple of 128) that divides the flat
    # length, so the reshape is metadata-only and stores are unmasked vst.
    lane_w = None
    for cand in (4096, 2048, 1024, 512, 256, 128):
        if total % cand == 0:
            lane_w = cand
            break

    if lane_w is not None:
        rows = total // lane_w
        x2d = x.reshape(rows, lane_w)
        # Only alias when the reshape produced a fresh array, so the caller's
        # `x` is never invalidated by donation in eager mode.
        y2d = _copy_tiled_2d(x2d, alias=(x2d is not x))
        return y2d.reshape(orig_shape)

    # Rare path: flat length is not a multiple of 128.
    nbytes = total * itemsize
    if nbytes <= 4 * 1024 * 1024:
        # Whole array in a single block (full-extent block shapes are always legal).
        x1d = x.reshape(total)
        y1d = pl.pallas_call(
            _identity_kernel,
            out_shape=jax.ShapeDtypeStruct((total,), x.dtype),
            input_output_aliases=({0: 0} if x1d is not x else {}),
            cost_estimate=pl.CostEstimate(
                flops=0, transcendentals=0, bytes_accessed=2 * nbytes
            ),
        )(x1d)
        return y1d.reshape(orig_shape)

    # TODO(synk): for large non-128-multiple sizes, copy the 128-aligned bulk with
    # the tiled kernel and handle the <128-element tail separately instead of
    # paying a pad + slice round trip.
    pad = _LANE - (total % _LANE)
    x1d = jnp.pad(x.reshape(total), (0, pad))
    y1d = _copy_tiled_2d(x1d.reshape(-1, _LANE), alias=True)
    return y1d.reshape(-1)[:total].reshape(orig_shape)


if __name__ == "__main__":
    key = jax.random.PRNGKey(0)
    x = jax.random.normal(key, (2, 4, 16, 16), dtype=jnp.float32)

    y = identity(x)
    jax.block_until_ready(y)

    assert y.shape == x.shape, (y.shape, x.shape)
    assert y.dtype == x.dtype, (y.dtype, x.dtype)
    assert bool(jnp.all(y == x)), "identity output mismatch"

    print("KERNEL_OK")
</pallas_src>

<mosaic_0001>
module attributes {stable_mosaic.version = 11 : i64} {
  func.func @_identity_kernel(%arg0: i32, %arg1: memref<1x2048xf32, #tpu.memory_space<vmem>>, %arg2: memref<1x2048xf32, #tpu.memory_space<vmem>>) attributes {dimension_semantics = [#tpu.dimension_semantics<parallel>], iteration_bounds = array<i64: 1>, scalar_prefetch = 0 : i64, scratch_operands = 0 : i64, tpu.core_type = #tpu.core_type<tc>, window_params = [{transform_indices = @transform_0, window_bounds = array<i64: 1, 2048>}, {transform_indices = @transform_1, window_bounds = array<i64: 1, 2048>}]} {
    %c0 = arith.constant 0 : index
    %c0_0 = arith.constant 0 : index
    %0 = vector.load %arg1[%c0, %c0_0] : memref<1x2048xf32, #tpu.memory_space<vmem>>, vector<1x2048xf32>
    %c0_1 = arith.constant 0 : index
    %c0_2 = arith.constant 0 : index
    %1 = vector.load %arg2[%c0_1, %c0_2] : memref<1x2048xf32, #tpu.memory_space<vmem>>, vector<1x2048xf32>
    tpu.vector_store %arg2[%c0_1, %c0_2], %0 {strides = array<i32>} : memref<1x2048xf32, #tpu.memory_space<vmem>>, vector<1x2048xf32>,
    return
  }
  func.func @transform_0(%arg0: i32) -> (i32, i32) {
    %c0_i32 = arith.constant 0 : i32
    %c0_i32_0 = arith.constant 0 : i32
    return %arg0, %c0_i32 : i32, i32
  }
  func.func @transform_1(%arg0: i32) -> (i32, i32) {
    %c0_i32 = arith.constant 0 : i32
    %c0_i32_0 = arith.constant 0 : i32
    return %arg0, %c0_i32 : i32, i32
  }
}

</mosaic_0001>

<bundles_post_ra>
// kernel: tpu_custom_call.1
= control target key start
LH: loop header
LB: loop body
LE: loop exit
PB: predicated region body
PF: predicated region fallthrough
CT: control target
= control target key end

     0   :  { %6 = vsyncpa [#allocation3], 0  ;;  %s116_s0 = inlined_call_operand.hbm [shape: f32[1,2048], index: 0, kind: input, shape index: {}, may-alias: {0,1}]   ;;  %s117_s1 = inlined_call_operand.hbm [shape: f32[1,2048], index: 1, kind: output, shape index: {}, may-alias: {0,1}]  }
   0x1   :  { %7 = vsyncpa [#allocation4], 0  ;;  %s13_s8 = sshll.u32 %s116_s0, 4  ;;  %s98_s9 = smov [#allocation2]   ;;  %s14_s8 = int_to_ptr.hbm [resolvable:$true] %s13_s8 }
   0x2   :  { %s15_s10 = sshll.u32 %s98_s9, 4  ;;  %s16_s10 = int_to_ptr.vmem [resolvable:$true] %s15_s10 }
   0x3   :  { %18 = dma.hbm_to_vmem [thread:$0]  %s14_s8, 256, %s16_s10, [#allocation3]  }
   0x4   :  { %94 = dma.done.wait [#allocation3], 256  }
   0x5   :  { %95 = vsyncadd [#allocation3], 4294967040  ;;  %s99_s11 = smov [#allocation5]   ;;  %s34_s15 = sshll.u32 %s117_s1, 4  ;;  %v23_v0 = vld [vmem:[#allocation2] sm:$0xff]  ;;  %v24_v1 = vld [vmem:[#allocation2 + $0x8] sm:$0xff]  ;;  %s35_s15 = int_to_ptr.hbm [resolvable:$true] %s34_s15 }
   0x6   :  { %s32_s12 = sshll.u32 %s99_s11, 4  ;;  %25 = vst [vmem:[#allocation5] sm:$0xff] %v23_v0  ;;  %s33_s12 = int_to_ptr.vmem [resolvable:$true] %s32_s12 }
   0x7   :  { %26 = vst [vmem:[#allocation5 + $0x8] sm:$0xff] %v24_v1 }
   0x8   :  { %37 = dma.vmem_to_hbm [thread:$0]  %s33_s12, 256, %s35_s15, [#allocation4]  }
   0x9   :  { %96 = dma.done.wait [#allocation4], 256  }
   0xa   :  { %97 = vsyncadd [#allocation4], 4294967040 }
   0xb   :  { %42 = vsyncpa [#allocation3], 1 }
   0xc   :  { %43 = vsyncpa [#allocation4], 1 }

</bundles_post_ra>
